<compile_context>
chip_gen: v5e
topology: v5e:2x2
jax: 0.10.0
libtpu: 0.0.40
codegen_flags: <defaults>
</compile_context>

<pallas_src>
import math
import functools

import jax
import jax.numpy as jnp
from jax import lax
from jax.experimental import pallas as pl
from jax.experimental.pallas import tpu as pltpu


def _arcmargin_kernel(label_smem_ref, label_ref, x_ref, w_ref, out_ref, *,
                      s, cos_m, sin_m, th, mm, easy_margin, apply_margin,
                      tile_c, compute_dtype):
    # --- row L2-normalization (F.normalize, eps=1e-12) ---------------------
    # x is tiny (B x D); recomputing it per class tile keeps the class axis
    # safely "parallel" (no scratch shared across megacore shards) and the
    # cost hides under the W DMA.
    eps2 = 1e-24  # eps**2
    x = x_ref[...].astype(jnp.float32)
    x_n = x * lax.rsqrt(jnp.maximum(jnp.sum(x * x, axis=-1, keepdims=True), eps2))

    w = w_ref[...].astype(jnp.float32)
    w_n = w * lax.rsqrt(jnp.maximum(jnp.sum(w * w, axis=-1, keepdims=True), eps2))

    # --- cosine = x_n @ w_n.T on the MXU, contraction expressed on D -------
    cosine = lax.dot_general(
        x_n.astype(compute_dtype), w_n.astype(compute_dtype),
        dimension_numbers=(((1,), (1,)), ((), ())),
        preferred_element_type=jnp.float32)                 # (B, TILE_C) f32

    def scale_only():
        out_ref[...] = (cosine * s).astype(out_ref.dtype)

    if not apply_margin:
        scale_only()
        return

    # --- skip margin math on class tiles that hold no label column ---------
    c_start = pl.program_id(0) * tile_c
    n_lab = label_smem_ref.shape[0]

    def _contains(i, acc):
        lab = label_smem_ref[i]
        hit = jnp.logical_and(lab >= c_start, lab < c_start + tile_c)
        return acc | hit.astype(jnp.int32)

    has_label = lax.fori_loop(0, n_lab, _contains, jnp.int32(0)) > 0

    @pl.when(has_label)
    def _():
        sine = jnp.sqrt(jnp.clip(1.0 - cosine * cosine, 0.0, 1.0))
        phi = cosine * cos_m - sine * sin_m
        if easy_margin:
            phi = jnp.where(cosine > 0.0, phi, cosine)
        else:
            phi = jnp.where(cosine > th, phi, cosine - mm)
        # Global column index (offset by the tile start — the classic bug).
        col = jax.lax.broadcasted_iota(jnp.int32, cosine.shape, 1) + c_start
        is_target = col == label_ref[...]                   # (B, TILE_C)
        out_ref[...] = (jnp.where(is_target, phi, cosine) * s).astype(out_ref.dtype)

    @pl.when(jnp.logical_not(has_label))
    def _():
        scale_only()


def arc_margin_product(x, weight, label=None, *, s=30.0, m=0.5,
                       easy_margin=False, training=True,
                       compute_dtype=jnp.float32, tile_c=None):
    """Pallas TPU implementation of ArcMarginProduct.forward.

    compute_dtype=jnp.bfloat16 streams the weight tiles and feeds the MXU in
    bf16 (f32 accumulation); ideally the caller already stores W in bf16.
    """
    B, D = x.shape
    C, D2 = weight.shape
    assert D == D2

    apply_margin = bool(training and (label is not None))
    bytes_w = jnp.dtype(compute_dtype).itemsize

    # ---- lane-dense class tile, sized against a conservative VMEM budget --
    if tile_c is None:
        c128 = 128 * pl.cdiv(C, 128)
        per_buf_budget = 8 * 1024 * 1024      # per W buffer; 2x buffered => 16 MiB
        max_rows = max(128, (per_buf_budget // max(D * bytes_w, 1)) // 128 * 128)
        tile_c = int(min(c128, max_rows, 2048))
    assert tile_c % 128 == 0

    num_tiles = int(pl.cdiv(C, tile_c))
    c_pad = num_tiles * tile_c

    # Stream the weight in compute_dtype (bf16 halves the dominant HBM term).
    w_stream = weight.astype(compute_dtype)
    if c_pad != C:
        # Zero padding: padded rows normalize to 0 cosine and never match a label.
        w_stream = jnp.pad(w_stream, ((0, c_pad - C), (0, 0)))

    x_in = x.astype(jnp.float32)

    if label is None:
        label_flat = jnp.full((B,), -1, dtype=jnp.int32)
    else:
        label_flat = label.reshape(B).astype(jnp.int32)
    label_col = label_flat.reshape(B, 1)

    kernel = functools.partial(
        _arcmargin_kernel,
        s=float(s),
        cos_m=math.cos(m),
        sin_m=math.sin(m),
        th=math.cos(math.pi - m),
        mm=math.sin(math.pi - m) * m,
        easy_margin=easy_margin,
        apply_margin=apply_margin,
        tile_c=tile_c,
        compute_dtype=compute_dtype,
    )

    # Rough VMEM need: double-buffered W tile + double-buffered out tile + x.
    need = 2 * tile_c * D * bytes_w + 2 * B * tile_c * 4 + B * D * 4 + 4 * B
    vmem_limit = int(min(max(4 * need, 32 << 20), 48 << 20))

    out = pl.pallas_call(
        kernel,
        out_shape=jax.ShapeDtypeStruct((B, c_pad), jnp.float32),
        grid_spec=pltpu.PrefetchScalarGridSpec(
            num_scalar_prefetch=1,                       # labels -> SMEM
            grid=(num_tiles,),
            in_specs=[
                pl.BlockSpec((B, 1), lambda j, lab: (0, 0)),       # label (B,1), resident
                pl.BlockSpec((B, D), lambda j, lab: (0, 0)),       # x, resident
                pl.BlockSpec((tile_c, D), lambda j, lab: (j, 0)),  # W tile, streamed
                # NOTE: if the DMA is still exposed, sweep pipeline_mode=pl.Buffered(3)
                # on the W spec against VMEM headroom (tighter on v7x).
            ],
            out_specs=pl.BlockSpec((B, tile_c), lambda j, lab: (0, j)),
        ),
        compiler_params=pltpu.CompilerParams(
            dimension_semantics=("parallel",),           # megacore on v7x
            vmem_limit_bytes=vmem_limit),
    )(label_flat, label_col, x_in, w_stream)

    if c_pad != C:
        out = out[:, :C]
    return out


def _reference(x, weight, label, *, s=30.0, m=0.5, easy_margin=False,
               training=True):
    """Pure-JAX reference mirroring the PyTorch forward."""
    def l2n(v):
        return v / jnp.maximum(jnp.linalg.norm(v, axis=-1, keepdims=True), 1e-12)

    cosine = l2n(x) @ l2n(weight).T
    if training and label is not None:
        sine = jnp.sqrt(jnp.clip(1.0 - cosine ** 2, 0.0, 1.0))
        phi = cosine * math.cos(m) - sine * math.sin(m)
        if easy_margin:
            phi = jnp.where(cosine > 0, phi, cosine)
        else:
            phi = jnp.where(cosine > math.cos(math.pi - m),
                            phi, cosine - math.sin(math.pi - m) * m)
        one_hot = jax.nn.one_hot(label, cosine.shape[1], dtype=cosine.dtype)
        return (one_hot * phi + (1.0 - one_hot) * cosine) * s
    return s * cosine


if __name__ == "__main__":
    key = jax.random.PRNGKey(0)
    B, in_features, out_features = 8, 32, 300   # C=300 exercises padding + multi-tile

    k_x, k_w, k_l = jax.random.split(key, 3)
    x = jax.random.normal(k_x, (B, in_features), dtype=jnp.float32)

    # Deterministic xavier_uniform_ init for weight (out_features, in_features).
    bound = math.sqrt(6.0 / (in_features + out_features))
    weight = jax.random.uniform(k_w, (out_features, in_features),
                                dtype=jnp.float32, minval=-bound, maxval=bound)
    label = jax.random.randint(k_l, (B,), 0, out_features, dtype=jnp.int32)

    # 1) Training forward, f32, explicit small tile -> 3-tile grid + padding.
    out_train = jax.block_until_ready(
        arc_margin_product(x, weight, label, training=True, tile_c=128))
    ref_train = _reference(x, weight, label, training=True)
    assert jnp.allclose(out_train, ref_train, atol=1e-4, rtol=1e-4), "train mismatch"

    # 2) Training forward, f32, auto tile size (single tile).
    out_auto = jax.block_until_ready(
        arc_margin_product(x, weight, label, training=True))
    assert jnp.allclose(out_auto, ref_train, atol=1e-4, rtol=1e-4), "auto-tile mismatch"

    # 3) Eval forward (no margin), f32.
    out_eval = jax.block_until_ready(
        arc_margin_product(x, weight, None, training=False, tile_c=128))
    ref_eval = _reference(x, weight, None, training=False)
    assert jnp.allclose(out_eval, ref_eval, atol=1e-4, rtol=1e-4), "eval mismatch"

    # 4) Training forward with bf16 weight streaming / MXU inputs (loose tol:
    #    bf16 cosine error ~1e-2, scaled by s=30).
    out_bf16 = jax.block_until_ready(
        arc_margin_product(x, weight, label, training=True, tile_c=128,
                           compute_dtype=jnp.bfloat16))
    assert jnp.max(jnp.abs(out_bf16 - ref_train)) < 0.5, "bf16 mismatch"

    print("KERNEL_OK")
</pallas_src>

<mosaic_0001>
module attributes {stable_mosaic.version = 11 : i64} {
  func.func @_arcmargin_kernel(%arg0: i32, %arg1: memref<8xi32, #tpu.memory_space<smem>>, %arg2: memref<8x1xi32, #tpu.memory_space<vmem>>, %arg3: memref<8x32xf32, #tpu.memory_space<vmem>>, %arg4: memref<128x32xf32, #tpu.memory_space<vmem>>, %arg5: memref<8x128xf32, #tpu.memory_space<vmem>>) attributes {dimension_semantics = [#tpu.dimension_semantics<parallel>], iteration_bounds = array<i64: 3>, scalar_prefetch = 1 : i64, scratch_operands = 0 : i64, tpu.core_type = #tpu.core_type<tc>, window_params = [{pipeline_mode = #tpu.pipeline_mode<synchronous>, transform_indices = @transform_0, window_bounds = array<i64: 8, 1>}, {pipeline_mode = #tpu.pipeline_mode<synchronous>, transform_indices = @transform_1, window_bounds = array<i64: 8, 32>}, {transform_indices = @transform_2, window_bounds = array<i64: 128, 32>}, {transform_indices = @transform_3, window_bounds = array<i64: 8, 128>}]} {
    %c0 = arith.constant 0 : index
    %c0_0 = arith.constant 0 : index
    %0 = vector.load %arg3[%c0, %c0_0] : memref<8x32xf32, #tpu.memory_space<vmem>>, vector<8x32xf32>
    %1 = arith.mulf %0, %0 : vector<8x32xf32>
    %cst = arith.constant dense<0.000000e+00> : vector<8xf32>
    %2 = vector.multi_reduction <add>, %1, %cst [1] : vector<8x32xf32> to vector<8xf32>
    %3 = vector.shape_cast %2 : vector<8xf32> to vector<8x1xf32>
    %cst_1 = arith.constant 1.000000e-24 : f32
    %4 = vector.broadcast %cst_1 : f32 to vector<8x1xf32>
    %5 = arith.maximumf %3, %4 : vector<8x1xf32>
    %6 = math.rsqrt %5 : vector<8x1xf32>
    %7 = vector.broadcast %6 : vector<8x1xf32> to vector<8x32xf32>
    %8 = arith.mulf %0, %7 : vector<8x32xf32>
    %c0_2 = arith.constant 0 : index
    %c0_3 = arith.constant 0 : index
    %9 = vector.load %arg4[%c0_2, %c0_3] : memref<128x32xf32, #tpu.memory_space<vmem>>, vector<128x32xf32>
    %10 = arith.mulf %9, %9 : vector<128x32xf32>
    %cst_4 = arith.constant dense<0.000000e+00> : vector<128xf32>
    %11 = vector.multi_reduction <add>, %10, %cst_4 [1] : vector<128x32xf32> to vector<128xf32>
    %12 = vector.shape_cast %11 : vector<128xf32> to vector<128x1xf32>
    %cst_5 = arith.constant 1.000000e-24 : f32
    %13 = vector.broadcast %cst_5 : f32 to vector<128x1xf32>
    %14 = arith.maximumf %12, %13 : vector<128x1xf32>
    %15 = math.rsqrt %14 : vector<128x1xf32>
    %16 = vector.broadcast %15 : vector<128x1xf32> to vector<128x32xf32>
    %17 = arith.mulf %9, %16 : vector<128x32xf32>
    %cst_6 = arith.constant dense<0.000000e+00> : vector<8x128xf32>
    %18 = tpu.matmul %8, %17, %cst_6 {dimension_numbers = #tpu.dot_dimension_numbers<[1], [1], [0], [0], [0, 0, 1, 0], [], []>} : vector<8x32xf32>, vector<128x32xf32>, vector<8x128xf32> -> vector<8x128xf32>
    %c128_i32 = arith.constant 128 : i32
    %19 = arith.muli %arg0, %c128_i32 : i32
    %c0_i32 = arith.constant 0 : i32
    %c0_i32_7 = arith.constant 0 : i32
    %c8_i32 = arith.constant 8 : i32
    %20 = arith.addi %c0_i32_7, %c8_i32 : i32
    %c1_i32 = arith.constant 1 : i32
    %21 = scf.for %arg6 = %c0_i32_7 to %20 step %c1_i32 iter_args(%arg7 = %c0_i32) -> (i32)  : i32 {
      %28 = arith.index_cast %arg6 : i32 to index
      %29 = memref.load %arg1[%28] : memref<8xi32, #tpu.memory_space<smem>>
      %30 = arith.cmpi sge, %29, %19 : i32
      %c128_i32_12 = arith.constant 128 : i32
      %31 = arith.addi %19, %c128_i32_12 : i32
      %32 = arith.cmpi slt, %29, %31 : i32
      %33 = arith.andi %30, %32 : i1
      %34 = arith.extui %33 : i1 to i32
      %35 = arith.ori %arg7, %34 : i32
      scf.yield %35 : i32
    }
    %c8_i32_8 = arith.constant 8 : i32
    %c0_i32_9 = arith.constant 0 : i32
    %22 = arith.cmpi sgt, %21, %c0_i32_9 : i32
    %23 = arith.extui %22 : i1 to i32
    %c0_i32_10 = arith.constant 0 : i32
    %24 = arith.cmpi ne, %23, %c0_i32_10 : i32
    scf.if %24 {
      %28 = arith.mulf %18, %18 : vector<8x128xf32>
      %cst_12 = arith.constant 1.000000e+00 : f32
      %29 = vector.broadcast %cst_12 : f32 to vector<8x128xf32>
      %30 = arith.subf %29, %28 : vector<8x128xf32>
      %cst_13 = arith.constant 0.000000e+00 : f32
      %cst_14 = arith.constant 1.000000e+00 : f32
      %31 = vector.broadcast %cst_13 : f32 to vector<8x128xf32>
      %32 = arith.maximumf %31, %30 : vector<8x128xf32>
      %33 = vector.broadcast %cst_14 : f32 to vector<8x128xf32>
      %34 = arith.minimumf %33, %32 : vector<8x128xf32>
      %35 = math.sqrt %34 : vector<8x128xf32>
      %cst_15 = arith.constant 0.87758255 : f32
      %36 = vector.broadcast %cst_15 : f32 to vector<8x128xf32>
      %37 = arith.mulf %18, %36 : vector<8x128xf32>
      %cst_16 = arith.constant 0.47942555 : f32
      %38 = vector.broadcast %cst_16 : f32 to vector<8x128xf32>
      %39 = arith.mulf %35, %38 : vector<8x128xf32>
      %40 = arith.subf %37, %39 : vector<8x128xf32>
      %cst_17 = arith.constant -0.87758255 : f32
      %41 = vector.broadcast %cst_17 : f32 to vector<8x128xf32>
      %42 = arith.cmpf ogt, %18, %41 : vector<8x128xf32>
      %cst_18 = arith.constant 0.239712775 : f32
      %43 = vector.broadcast %cst_18 : f32 to vector<8x128xf32>
      %44 = arith.subf %18, %43 : vector<8x128xf32>
      %45 = arith.select %42, %40, %44 : vector<8x128xi1>, vector<8x128xf32>
      %46 = tpu.iota {dimensions = array<i32: 1>} : vector<8x128xi32>
      %47 = vector.broadcast %19 : i32 to vector<8x128xi32>
      %48 = arith.addi %46, %47 : vector<8x128xi32>
      %c0_19 = arith.constant 0 : index
      %c0_20 = arith.constant 0 : index
      %49 = vector.load %arg2[%c0_19, %c0_20] : memref<8x1xi32, #tpu.memory_space<vmem>>, vector<8x1xi32>
      %50 = vector.broadcast %49 : vector<8x1xi32> to vector<8x128xi32>
      %51 = arith.cmpi eq, %48, %50 : vector<8x128xi32>
      %52 = arith.select %51, %45, %18 : vector<8x128xi1>, vector<8x128xf32>
      %cst_21 = arith.constant 3.000000e+01 : f32
      %53 = vector.broadcast %cst_21 : f32 to vector<8x128xf32>
      %54 = arith.mulf %52, %53 : vector<8x128xf32>
      %c0_22 = arith.constant 0 : index
      %c0_23 = arith.constant 0 : index
      %55 = vector.load %arg5[%c0_22, %c0_23] : memref<8x128xf32, #tpu.memory_space<vmem>>, vector<8x128xf32>
      tpu.vector_store %arg5[%c0_22, %c0_23], %54 {strides = array<i32>} : memref<8x128xf32, #tpu.memory_space<vmem>>, vector<8x128xf32>,
    } else {
    }
    %true = arith.constant true
    %25 = arith.xori %22, %true : i1
    %26 = arith.extui %25 : i1 to i32
    %c0_i32_11 = arith.constant 0 : i32
    %27 = arith.cmpi ne, %26, %c0_i32_11 : i32
    scf.if %27 {
      %cst_12 = arith.constant 3.000000e+01 : f32
      %28 = vector.broadcast %cst_12 : f32 to vector<8x128xf32>
      %29 = arith.mulf %18, %28 : vector<8x128xf32>
      %c0_13 = arith.constant 0 : index
      %c0_14 = arith.constant 0 : index
      %30 = vector.load %arg5[%c0_13, %c0_14] : memref<8x128xf32, #tpu.memory_space<vmem>>, vector<8x128xf32>
      tpu.vector_store %arg5[%c0_13, %c0_14], %29 {strides = array<i32>} : memref<8x128xf32, #tpu.memory_space<vmem>>, vector<8x128xf32>,
    } else {
    }
    return
  }
  func.func @transform_0(%arg0: i32, %arg1: memref<8xi32, #tpu.memory_space<smem>>) -> (i32, i32) {
    %c0_i32 = arith.constant 0 : i32
    %c0_i32_0 = arith.constant 0 : i32
    %c0_i32_1 = arith.constant 0 : i32
    return %c0_i32, %c0_i32_0 : i32, i32
  }
  func.func @transform_1(%arg0: i32, %arg1: memref<8xi32, #tpu.memory_space<smem>>) -> (i32, i32) {
    %c0_i32 = arith.constant 0 : i32
    %c0_i32_0 = arith.constant 0 : i32
    %c0_i32_1 = arith.constant 0 : i32
    return %c0_i32, %c0_i32_0 : i32, i32
  }
  func.func @transform_2(%arg0: i32, %arg1: memref<8xi32, #tpu.memory_space<smem>>) -> (i32, i32) {
    %c0_i32 = arith.constant 0 : i32
    %c0_i32_0 = arith.constant 0 : i32
    return %arg0, %c0_i32 : i32, i32
  }
  func.func @transform_3(%arg0: i32, %arg1: memref<8xi32, #tpu.memory_space<smem>>) -> (i32, i32) {
    %c0_i32 = arith.constant 0 : i32
    %c0_i32_0 = arith.constant 0 : i32
    return %c0_i32, %arg0 : i32, i32
  }
}

</mosaic_0001>

<bundles_post_ra>
// kernel: tpu_custom_call.1
= control target key start
LH: loop header
LB: loop body
LE: loop exit
PB: predicated region body
PF: predicated region fallthrough
CT: control target
= control target key end

     0   :  { %s905_s18 = smov [#allocation3]   ;;  %s1423_s0 = inlined_call_operand.vmem [shape: s32[8], index: 0, kind: input, shape index: {}]   ;;  %s1424_s1 = inlined_call_operand.vmem [shape: s32[8,1], index: 1, kind: input, shape index: {}]   ;;  %s1425_s2 = inlined_call_operand.vmem [shape: f32[8,32], index: 2, kind: input, shape index: {}]   ;;  %s1426_s3 = inlined_call_operand.vmem [shape: f32[384,32], index: 3, kind: input, shape index: {}]   ;;  %s1427_s4 = inlined_call_operand.hbm [shape: f32[8,384], index: 4, kind: output, shape index: {}]  }
   0x1   :  { %s10_s17 = sshll.u32 %s1423_s0, 4  ;;  %s11_s17 = int_to_ptr.vmem [resolvable:$true] %s10_s17 }
   0x2   :  { %13 = dma.vmem_to_smem %s11_s17, 16, %s905_s18, [#allocation2] }
   0x3   :  { %875 = dma.done.wait [#allocation2], 16 }
   0x4   :  { %876 = vsyncadd [#allocation2], 4294967280 }
   0x5   :  { %16 = sfence }
   0x6   :  { %17 = vsyncpa [#allocation5], 0 }
   0x7   :  { %19 = vsyncpa [#allocation5 + $0x1], 0  ;;  %s935_s19 = smov 0   ;;  %s937_s20 = smov 0  }
   0x8   :  { %s939_s21 = smov 0   ;;  %s941_s22 = smov 0  }
   0x9 LB: > { %s956_s0 = sadd.s32 4294967295, %s895_s22   ;;  %s684_s23 = sadd.s32 4294967294, %s895_s22   ;;  %s895_s22 = sphi %s941_s22, %s1454_s22   ;;  %s891_s21 = sphi %s939_s21, %s1453_s21   ;;  %s887_s20 = sphi %s937_s20, %s1452_s20   ;;  %s883_s19 = sphi %s935_s19, %s1451_s19  }
   0xa   : > { %s960_s24 = sadd.s32 1, %s895_s22   ;;  %s100_s25 = sadd.s32 1, %s891_s21 }
   0xb   : > { %s97_s26 = ssub.s32 %s895_s22, %s960_s24  ;;  %p110_p0 = scmp.ne.s32.totalorder %s891_s21, %s887_s20 }
   0xc   : > { %p98_p1 = scmp.eq.s32.totalorder %s97_s26, 0  ;;  %p111_p2 = scmp.eq.s32.totalorder %s956_s0, 2 }
   0xd   : > { %p116_p3 = scmp.ne.s32.totalorder %s887_s20, %s883_s19  ;;  %p117_p4 = scmp.eq.s32.totalorder %s684_s23, 2 }
   0xe   : > { %s971_s27 = scalar_select %p98_p1, %s891_s21, %s100_s25  }
   0xf   : > { %p973_p5 = por %p111_p2, %p110_p0  ;;  %p977_p6 = por %p117_p4, %p116_p3 }
  0x10   : > { %p687_p7 = scmp.ge.s32.totalorder %s895_s22, 1  ;;  %p150_p8 = scmp.lt.s32.totalorder %s895_s22, 4 }
  0x12   : > { %p151_p9 = pnand %p687_p7, %p150_p8 }
  0x13   : > { %s689_s30 = sshll.u32 (!%p151_p9), %s956_s0, 4  ;;  %s171_s9 = sand.u32 (!%p151_p9), 1, %s887_s20  }
  0x14   : > { %154 = sbr.rel (%p151_p9) target bundleno = 531 (0x213), region = 32  ;;  %p175_p10 = scmp.lt.s32.totalorder (!%p151_p9), %s689_s30, 47 }
  0x15   : > { %s1070_s10 = sshll.u32 (!%p151_p9), %s171_s9, 3  ;;  %s1369_s13 = sshll.u32 (!%p151_p9), %s956_s0, 7 }
  0x16   : > { %s1374_s14 = scalar_lea.vmem (!%p151_p9), [#allocation4], %s1070_s10  ;;  %s897_s15 = smov (!%p151_p9), 0  }
  0x17   : > { %s901_s16 = smov (!%p151_p9), 0  }
  0x19   : > { %s1456_s30 = smov (!%p175_p10, %s689_s30), 47  ;;  %vm182_vm0 = vcmask 261120   ;;  %v1090_v46 = vld [vmem:[%s1425_s2] sm:$0xff] }
  0x1a   : > { %s690_s5 = sshll.u32 %s1456_s30, 3  ;;  %v181_v48 = vmul.f32 %v1090_v46, %v1090_v46 }
  0x1b   : > { %s987_s8 = scalar_lea.vmem %s1426_s3, %s690_s5 }
  0x1c   : > { %v990_v0 = vld [vmem:[%s987_s8 + $0x78] sm:$0xff]  ;;  %v993_v1 = vld [vmem:[%s987_s8 + $0x68] sm:$0xff]  ;;  %v1005_v6 = vld [vmem:[%s987_s8 + $0x70] sm:$0xff]  ;;  %v183_v50 = vsel %vm182_vm0, %v181_v48, 0.0 }
  0x1d   : > { %v996_v2 = vld [vmem:[%s987_s8 + $0x58] sm:$0xff]  ;;  %v229_v3 = vmul.f32 %v990_v0, %v990_v0  ;;  %v227_v4 = vmul.f32 %v993_v1, %v993_v1  ;;  %v1008_v7 = vld [vmem:[%s987_s8 + $0x60] sm:$0xff]  ;;  %v1014_v11 = vld [vmem:[%s987_s8 + $0x50] sm:$0xff]  ;;  %v228_v12 = vmul.f32 %v1005_v6, %v1005_v6 }
  0x1e   : > { %v225_v5 = vmul.f32 %v996_v2, %v996_v2  ;;  %v226_v13 = vmul.f32 %v1008_v7, %v1008_v7  ;;  %v224_v14 = vmul.f32 %v1014_v11, %v1014_v11  ;;  %v1026_v18 = vld [vmem:[%s987_s8 + $0x48] sm:$0xff]  ;;  %v1029_v19 = vld [vmem:[%s987_s8 + $0x40] sm:$0xff]  ;;  %v1032_v20 = vld [vmem:[%s987_s8 + $0x38] sm:$0xff] }
  0x1f   : > { %v275_v8 = vsel %vm182_vm0, %v229_v3, 0.0  ;;  %v269_v9 = vsel %vm182_vm0, %v227_v4, 0.0  ;;  %v272_v15 = vsel %vm182_vm0, %v228_v12, 0.0  ;;  %v223_v21 = vmul.f32 %v1026_v18, %v1026_v18  ;;  %v1044_v27 = vld [vmem:[%s987_s8 + $0x30] sm:$0xff]  ;;  %v1047_v28 = vld [vmem:[%s987_s8 + $0x28] sm:$0xff]  ;;  %v1050_v29 = vld [vmem:[%s987_s8 + $0x20] sm:$0xff] }
  0x20   : > { %v263_v10 = vsel %vm182_vm0, %v225_v5, 0.0  ;;  %276 = vadd.xlane.f32.xlu0 %v275_v8  ;;  %270 = vadd.xlane.f32.xlu1 %v269_v9  ;;  %v266_v16 = vsel %vm182_vm0, %v226_v13, 0.0  ;;  %v260_v17 = vsel %vm182_vm0, %v224_v14, 0.0  ;;  %v222_v22 = vmul.f32 %v1029_v19, %v1029_v19  ;;  %v1063_v36 = vld [vmem:[%s987_s8 + $0x18] sm:$0xff]  ;;  %v1066_v37 = vld [vmem:[%s987_s8 + $0x10] sm:$0xff]  ;;  %v1073_v38 = vld [vmem:[%s987_s8 + $0x8] sm:$0xff] }
  0x21   : > { %264 = vadd.xlane.f32.xlu2 %v263_v10  ;;  %v221_v23 = vmul.f32 %v1032_v20, %v1032_v20  ;;  %v257_v24 = vsel %vm182_vm0, %v223_v21, 0.0  ;;  %v220_v30 = vmul.f32 %v1044_v27, %v1044_v27  ;;  %v219_v31 = vmul.f32 %v1047_v28, %v1047_v28  ;;  %v1085_v45 = vld [vmem:[%s987_s8] sm:$0xff] }
  0x22   : > { %v254_v25 = vsel %vm182_vm0, %v222_v22, 0.0  ;;  %v218_v32 = vmul.f32 %v1050_v29, %v1050_v29  ;;  %v217_v39 = vmul.f32 %v1063_v36, %v1063_v36  ;;  %v216_v40 = vmul.f32 %v1066_v37, %v1066_v37 }
  0x23   : > { %v251_v26 = vsel %vm182_vm0, %v221_v23, 0.0  ;;  %v248_v33 = vsel %vm182_vm0, %v220_v30, 0.0  ;;  %v245_v34 = vsel %vm182_vm0, %v219_v31, 0.0  ;;  %v215_v41 = vmul.f32 %v1073_v38, %v1073_v38 }
  0x24   : > { %v242_v35 = vsel %vm182_vm0, %v218_v32, 0.0  ;;  %v239_v42 = vsel %vm182_vm0, %v217_v39, 0.0  ;;  %v236_v43 = vsel %vm182_vm0, %v216_v40, 0.0  ;;  %v214_v47 = vmul.f32 %v1085_v45, %v1085_v45 }
  0x25   : > { %v233_v44 = vsel %vm182_vm0, %v215_v41, 0.0 }
  0x26   : > { %v230_v49 = vsel %vm182_vm0, %v214_v47, 0.0 }
  0x28   : > { %273 = vadd.xlane.f32.xlu0 %v272_v15  ;;  %267 = vadd.xlane.f32.xlu1 %v266_v16 }
  0x29   : > { %261 = vadd.xlane.f32.xlu2 %v260_v17 }
  0x30   : > { %258 = vadd.xlane.f32.xlu0 %v257_v24  ;;  %255 = vadd.xlane.f32.xlu1 %v254_v25 }
  0x31   : > { %252 = vadd.xlane.f32.xlu2 %v251_v26 }
  0x38   : > { %249 = vadd.xlane.f32.xlu0 %v248_v33  ;;  %246 = vadd.xlane.f32.xlu1 %v245_v34 }
  0x39   : > { %243 = vadd.xlane.f32.xlu2 %v242_v35 }
  0x40   : > { %240 = vadd.xlane.f32.xlu0 %v239_v42  ;;  %237 = vadd.xlane.f32.xlu1 %v236_v43 }
  0x41   : > { %234 = vadd.xlane.f32.xlu2 %v233_v44 }
  0x48   : > { %231 = vadd.xlane.f32.xlu0 %v230_v49  ;;  %184 = vadd.xlane.f32.xlu1 %v183_v50 }
  0x93   : > { %v277_v51 = vpop.xlane.xlu0 %276  ;;  %v271_v52 = vpop.xlane.xlu1 %270 }
  0x94   : > { %v293_v53 = vmax.f32 %v277_v51, 1e-24  ;;  %v1098_v54 = vmax.f32 %v271_v52, 1e-24  ;;  %v265_v55 = vpop.xlane.xlu2 %264 }
  0x95   : > { %v1101_v56 = vmax.f32 %v265_v55, 1e-24 }
  0x96   : > { %774 = vrsqrt.f32 %v293_v53  ;;  %vm450_vm2 = vweird.f32 %v293_v53  ;;  %vm430_vm4 = vweird.f32 %v1098_v54 }
  0x97   : > { %776 = vrsqrt.f32 %v1098_v54  ;;  %vm410_vm12 = vweird.f32 %v1101_v56 }
  0x98   : > { %778 = vrsqrt.f32 %v1101_v56 }
  0x9b   : > { %v274_v57 = vpop.xlane.xlu0 %273  ;;  %v268_v58 = vpop.xlane.xlu1 %267 }
  0x9c   : > { %v775_v59 = vpop.eup %774  ;;  %v292_v60 = vmax.f32 %v274_v57, 1e-24  ;;  %v1104_v61 = vmax.f32 %v268_v58, 1e-24  ;;  %v262_v62 = vpop.xlane.xlu2 %261 }
  0x9d   : > { %v1106_v63 = vpop.eup %776  ;;  %v445_v3 = vmul.f32 %v775_v59, %v293_v53  ;;  %v1108_v4 = vmax.f32 %v262_v62, 1e-24  ;;  %vm451_vm1 = vweird.f32 %v775_v59 }
  0x9e   : > { %v425_v5 = vmul.f32 %v1106_v63, %v1098_v54  ;;  %780 = vrsqrt.f32 %v292_v60  ;;  %v1113_v9 = vpop.eup %778  ;;  %vm452_vm3 = vmor %vm450_vm2, %vm451_vm1  ;;  %vm431_vm6 = vweird.f32 %v1106_v63  ;;  %vm440_vm7 = vweird.f32 %v292_v60 }
  0x9f   : > { %v446_v8 = vmul.f32 %v775_v59, %v445_v3  ;;  %782 = vrsqrt.f32 %v1104_v61  ;;  %v405_v16 = vmul.f32 %v1113_v9, %v1101_v56  ;;  %vm420_vm9 = vweird.f32 %v1104_v61  ;;  %vm1159_vm10 = vmor %vm430_vm4, %vm431_vm6 }
  0xa0   : > { %784 = vrsqrt.f32 %v1108_v4  ;;  %v426_v12 = vmul.f32 %v1106_v63, %v425_v5  ;;  %vm411_vm13 = vweird.f32 %v1113_v9  ;;  %vm400_vm1 = vweird.f32 %v1108_v4 }
  0xa1   : > { %v447_v10 = vmul.f32 0.5, %v446_v8  ;;  %v406_v33 = vmul.f32 %v1113_v9, %v405_v16  ;;  %vm1199_vm15 = vmor %vm410_vm12, %vm411_vm13 }
  0xa2   : > { %v427_v26 = vmul.f32 0.5, %v426_v12 }
  0xa3   : > { %v259_v13 = vpop.xlane.xlu0 %258  ;;  %v256_v14 = vpop.xlane.xlu1 %255  ;;  %v448_v23 = vsub.f32 1.5, %v447_v10  ;;  %v407_v50 = vmul.f32 0.5, %v406_v33 }
  0xa4   : > { %v781_v15 = vpop.eup %780  ;;  %v1119_v17 = vmax.f32 %v259_v13, 1e-24  ;;  %v1121_v21 = vmax.f32 %v256_v14, 1e-24  ;;  %v253_v25 = vpop.xlane.xlu2 %252  ;;  %v428_v41 = vsub.f32 1.5, %v427_v26 }
  0xa5   : > { %v1123_v22 = vpop.eup %782  ;;  %v435_v24 = vmul.f32 %v781_v15, %v292_v60  ;;  %v1133_v35 = vmax.f32 %v253_v25, 1e-24  ;;  %v449_v40 = vmul.f32 %v775_v59, %v448_v23  ;;  %vm441_vm5 = vweird.f32 %v781_v15 }
  0xa6   : > { %v415_v30 = vmul.f32 %v1123_v22, %v1104_v61  ;;  %786 = vrsqrt.f32 %v1119_v17  ;;  %v1128_v31 = vpop.eup %784  ;;  %v429_v3 = vmul.f32 %v1106_v63, %v428_v41  ;;  %vm442_vm8 = vmor %vm440_vm7, %vm441_vm5  ;;  %v408_v5 = vsub.f32 1.5, %v407_v50 }
  0xa7   : > { %v436_v32 = vmul.f32 %v781_v15, %v435_v24  ;;  %788 = vrsqrt.f32 %v1121_v21  ;;  %v395_v43 = vmul.f32 %v1128_v31, %v1108_v4  ;;  %v453_v47 = vsel %vm452_vm3, %v775_v59, %v449_v40 }
  0xa8   : > { %v416_v34 = vmul.f32 %v1123_v22, %v415_v30  ;;  %790 = vrsqrt.f32 %v1133_v35  ;;  %v469_v51 = vmul.f32 %v453_v47, %v990_v0  ;;  %vm421_vm11 = vweird.f32 %v1123_v22 }
  0xa9   : > { %v437_v39 = vmul.f32 0.5, %v436_v32  ;;  %v396_v59 = vmul.f32 %v1128_v31, %v395_v43  ;;  %v433_v54 = vsel %vm1159_vm10, %v1106_v63, %v429_v3  ;;  %vm1185_vm14 = vmor %vm420_vm9, %vm421_vm11  ;;  %v409_v61 = vmul.f32 %v1113_v9, %v408_v5 }
  0xaa   : > { %v417_v42 = vmul.f32 0.5, %v416_v34  ;;  %691 = vmatpush.xpose.msk.msra.mxu0 %vm182_vm0, %v469_v51  ;;  %v467_v26 = vmul.f32 %v433_v54, %v993_v1  ;;  %vm401_vm2 = vweird.f32 %v1128_v31  ;;  %vm390_vm4 = vweird.f32 %v1119_v17 }
  0xab   : > { %v438_v44 = vsub.f32 1.5, %v437_v39  ;;  %v250_v48 = vpop.xlane.xlu0 %249  ;;  %v247_v52 = vpop.xlane.xlu1 %246  ;;  %v413_v4 = vsel %vm1199_vm15, %v1113_v9, %v409_v61  ;;  %vm1219_vm3 = vmor %vm400_vm1, %vm401_vm2  ;;  %vm380_vm6 = vweird.f32 %v1121_v21  ;;  %vm370_vm10 = vweird.f32 %v1133_v35 }
  0xac   : > { %v1138_v49 = vpop.eup %786  ;;  %v1143_v53 = vmax.f32 %v250_v48, 1e-24  ;;  %v418_v58 = vsub.f32 1.5, %v417_v42  ;;  %v1152_v0 = vmax.f32 %v247_v52, 1e-24  ;;  %v244_v13 = vpop.xlane.xlu2 %243  ;;  %v465_v9 = vmul.f32 %v413_v4, %v996_v2 }
  0xad   : > { %v439_v55 = vmul.f32 %v781_v15, %v438_v44  ;;  %v1145_v57 = vpop.eup %788  ;;  %v385_v62 = vmul.f32 %v1138_v49, %v1119_v17  ;;  %vm391_vm5 = vweird.f32 %v1138_v49 }
  0xae   : > { %v375_v10 = vmul.f32 %v1145_v57, %v1121_v21  ;;  %792 = vrsqrt.f32 %v1143_v53  ;;  %v1168_v14 = vpop.eup %790  ;;  %v419_v23 = vmul.f32 %v1123_v22, %v418_v58  ;;  %vm381_vm7 = vweird.f32 %v1145_v57 }
  0xaf   : > { %v443_v60 = vsel %vm442_vm8, %v781_v15, %v439_v55  ;;  %v397_v15 = vmul.f32 0.5, %v396_v59  ;;  %v386_v16 = vmul.f32 %v1138_v49, %v385_v62  ;;  %794 = vrsqrt.f32 %v1152_v0  ;;  %vm1248_vm8 = vmor %vm390_vm4, %vm391_vm5 }
  0xb0   : > { %v468_v12 = vmul.f32 %v443_v60, %v1005_v6  ;;  %v1179_v6 = vmax.f32 %v244_v13, 1e-24  ;;  %v376_v63 = vmul.f32 %v1145_v57, %v375_v10  ;;  %v365_v25 = vmul.f32 %v1168_v14, %v1133_v35  ;;  %vm1263_vm9 = vmor %vm380_vm6, %vm381_vm7 }
  0xb1   : > { %v398_v56 = vsub.f32 1.5, %v397_v15  ;;  %v387_v30 = vmul.f32 0.5, %v386_v16  ;;  %v423_v33 = vsel %vm1185_vm14, %v1123_v22, %v419_v23  ;;  %vm371_vm11 = vweird.f32 %v1168_v14 }
  0xb2   : > { %692 = vmatpush.xpose.msk.msra.mxu0 %vm182_vm0, %v468_v12  ;;  %796 = vrsqrt.f32 %v1179_v6  ;;  %v377_v40 = vmul.f32 0.5, %v376_v63  ;;  %v366_v22 = vmul.f32 %v1168_v14, %v365_v25  ;;  %v466_v42 = vmul.f32 %v423_v33, %v1008_v7  ;;  %vm1283_vm12 = vmor %vm370_vm10, %vm371_vm11 }
  0xb3   : > { %v241_v32 = vpop.xlane.xlu0 %240  ;;  %v238_v43 = vpop.xlane.xlu1 %237  ;;  %v388_v44 = vsub.f32 1.5, %v387_v30  ;;  %v399_v48 = vmul.f32 %v1128_v31, %v398_v56  ;;  %vm360_vm13 = vweird.f32 %v1143_v53  ;;  %vm350_vm1 = vweird.f32 %v1152_v0 }
  0xb4   : > { %v1197_v34 = vpop.eup %792  ;;  %v1210_v41 = vmax.f32 %v241_v32, 1e-24  ;;  %v1227_v51 = vmax.f32 %v238_v43, 1e-24  ;;  %v367_v52 = vmul.f32 0.5, %v366_v22  ;;  %v378_v58 = vsub.f32 1.5, %v377_v40  ;;  %v235_v62 = vpop.xlane.xlu2 %234 }
  0xb5   : > { %v1207_v1 = vpop.eup %794  ;;  %v355_v47 = vmul.f32 %v1197_v34, %v1143_v53  ;;  %v403_v3 = vsel %vm1219_vm3, %v1128_v31, %v399_v48  ;;  %v389_v5 = vmul.f32 %v1138_v49, %v388_v44  ;;  %v1254_v8 = vmax.f32 %v235_v62, 1e-24 }
  0xb6   : > { %693 = vmatpush.xpose.msk.msra.mxu0 %vm182_vm0, %v467_v26  ;;  %v345_v7 = vmul.f32 %v1207_v1, %v1152_v0  ;;  %798 = vrsqrt.f32 %v1210_v41  ;;  %v464_v21 = vmul.f32 %v403_v3, %v1014_v11  ;;  %v368_v10 = vsub.f32 1.5, %v367_v52 }
  0xb7   : > { %v356_v59 = vmul.f32 %v1197_v34, %v355_v47  ;;  %800 = vrsqrt.f32 %v1227_v51  ;;  %v393_v15 = vsel %vm1248_vm8, %v1138_v49, %v389_v5  ;;  %v379_v17 = vmul.f32 %v1145_v57, %v378_v58 }
  0xb8   : > { %v1232_v55 = vpop.eup %796  ;;  %v346_v2 = vmul.f32 %v1207_v1, %v345_v7  ;;  %802 = vrsqrt.f32 %v1254_v8  ;;  %v463_v24 = vmul.f32 %v393_v15, %v1026_v18  ;;  %v369_v30 = vmul.f32 %v1168_v14, %v368_v10 }
  0xb9   : > { %v335_v31 = vmul.f32 %v1232_v55, %v1179_v6  ;;  %v357_v12 = vmul.f32 0.5, %v356_v59  ;;  %v383_v35 = vsel %vm1263_vm9, %v1145_v57, %v379_v17  ;;  %vm361_vm14 = vweird.f32 %v1197_v34 }
  0xba   : > { %694 = vmatpush.xpose.msk.msra.mxu0 %vm182_vm0, %v466_v42  ;;  %v347_v11 = vmul.f32 0.5, %v346_v2  ;;  %v462_v57 = vmul.f32 %v383_v35, %v1029_v19  ;;  %v373_v22 = vsel %vm1283_vm12, %v1168_v14, %v369_v30  ;;  %vm1303_vm15 = vmor %vm360_vm13, %vm361_vm14  ;;  %vm351_vm2 = vweird.f32 %v1207_v1 }
  0xbb   : > { %v232_v13 = vpop.xlane.xlu0 %231  ;;  %v336_v23 = vmul.f32 %v1232_v55, %v335_v31  ;;  %v185_v63 = vpop.xlane.xlu1 %184  ;;  %v358_v26 = vsub.f32 1.5, %v357_v12  ;;  %v461_v14 = vmul.f32 %v373_v22, %v1032_v20  ;;  %vm1319_vm3 = vmor %vm350_vm1, %vm351_vm2  ;;  %vm340_vm4 = vweird.f32 %v1179_v6 }
  0xbc   : > { %v1261_v16 = vpop.eup %798  ;;  %v1272_v49 = vmax.f32 %v232_v13, 1e-24  ;;  %v1290_v18 = vmax.f32 %v185_v63, 1e-24  ;;  %v348_v39 = vsub.f32 1.5, %v347_v11  ;;  %vm341_vm5 = vweird.f32 %v1232_v55 }
  0xbd   : > { %v1275_v25 = vpop.eup %800  ;;  %v325_v56 = vmul.f32 %v1261_v16, %v1210_v41  ;;  %v337_v33 = vmul.f32 0.5, %v336_v23  ;;  %v359_v53 = vmul.f32 %v1197_v34, %v358_v26  ;;  %vm1333_vm6 = vmor %vm340_vm4, %vm341_vm5  ;;  %vm330_vm7 = vweird.f32 %v1210_v41 }
  0xbe   : > { %695 = vmatpush.xpose.msk.msra.mxu0 %vm182_vm0, %v465_v9  ;;  %v315_v61 = vmul.f32 %v1275_v25, %v1227_v51  ;;  %804 = vrsqrt.f32 %v1272_v49  ;;  %v1301_v42 = vpop.eup %802  ;;  %v349_v50 = vmul.f32 %v1207_v1, %v348_v39  ;;  %vm331_vm8 = vweird.f32 %v1261_v16 }
  0xbf   : > { %v326_v40 = vmul.f32 %v1261_v16, %v325_v56  ;;  %806 = vrsqrt.f32 %v1290_v18  ;;  %v338_v19 = vsub.f32 1.5, %v337_v33  ;;  %v305_v4 = vmul.f32 %v1301_v42, %v1254_v8  ;;  %vm332_vm9 = vmor %vm330_vm7, %vm331_vm8 }
  0xc0   : > { %v316_v44 = vmul.f32 %v1275_v25, %v315_v61  ;;  %v363_v48 = vsel %vm1303_vm15, %v1197_v34, %v359_v53  ;;  %v353_v3 = vsel %vm1319_vm3, %v1207_v1, %v349_v50  ;;  %vm320_vm10 = vweird.f32 %v1227_v51 }
  0xc1   : > { %v327_v47 = vmul.f32 0.5, %v326_v40  ;;  %v460_v52 = vmul.f32 %v363_v48, %v1044_v27  ;;  %v339_v9 = vmul.f32 %v1232_v55, %v338_v19  ;;  %v306_v59 = vmul.f32 %v1301_v42, %v305_v4 }
  0xc2   : > { %696 = vmatpush.xpose.msk.msra.mxu0 %vm182_vm0, %v464_v21  ;;  %v317_v20 = vmul.f32 0.5, %v316_v44  ;;  %v459_v2 = vmul.f32 %v353_v3, %v1047_v28  ;;  %vm321_vm11 = vweird.f32 %v1275_v25  ;;  %vm310_vm13 = vweird.f32 %v1254_v8 }
  0xc3   : > { %v328_v34 = vsub.f32 1.5, %v327_v47  ;;  %v307_v60 = vmul.f32 0.5, %v306_v59  ;;  %v343_v1 = vsel %vm1333_vm6, %v1232_v55, %v339_v9  ;;  %vm322_vm12 = vmor %vm320_vm10, %vm321_vm11  ;;  %vm311_vm14 = vweird.f32 %v1301_v42 }
  0xc4   : > { %v805_v0 = vpop.eup %804  ;;  %v318_v27 = vsub.f32 1.5, %v317_v20  ;;  %v458_v10 = vmul.f32 %v343_v1, %v1050_v29  ;;  %vm312_vm15 = vmor %vm310_vm13, %vm311_vm14  ;;  %vm300_vm1 = vweird.f32 %v1272_v49  ;;  %vm193_vm4 = vweird.f32 %v1290_v18 }
  0xc5   : > { %v807_v58 = vpop.eup %806  ;;  %v295_v62 = vmul.f32 %v805_v0, %v1272_v49  ;;  %v329_v21 = vmul.f32 %v1261_v16, %v328_v34  ;;  %v308_v12 = vsub.f32 1.5, %v307_v60  ;;  %vm301_vm2 = vweird.f32 %v805_v0 }
  0xc6   : > { %697 = vmatpush.xpose.msk.msra.mxu0 %vm182_vm0, %v463_v24  ;;  %v188_v6 = vmul.f32 %v807_v58, %v1290_v18  ;;  %v319_v15 = vmul.f32 %v1275_v25, %v318_v27  ;;  %vm302_vm3 = vmor %vm300_vm1, %vm301_vm2  ;;  %vm194_vm5 = vweird.f32 %v807_v58 }
  0xc7   : > { %v296_v31 = vmul.f32 %v805_v0, %v295_v62  ;;  %v333_v13 = vsel %vm332_vm9, %v1261_v16, %v329_v21  ;;  %v309_v17 = vmul.f32 %v1301_v42, %v308_v12  ;;  %vm195_vm6 = vmor %vm193_vm4, %vm194_vm5 }
  0xc8   : > { %v189_v41 = vmul.f32 %v807_v58, %v188_v6  ;;  %v457_v51 = vmul.f32 %v333_v13, %v1063_v36  ;;  %v323_v29 = vsel %vm322_vm12, %v1275_v25, %v319_v15 }
  0xc9   : > { %v297_v28 = vmul.f32 0.5, %v296_v31  ;;  %v456_v8 = vmul.f32 %v323_v29, %v1066_v37  ;;  %v313_v23 = vsel %vm312_vm15, %v1301_v42, %v309_v17 }
  0xca   : > { %698 = vmatpush.xpose.msk.msra.mxu0 %vm182_vm0, %v462_v57  ;;  %v190_v55 = vmul.f32 0.5, %v189_v41  ;;  %v455_v24 = vmul.f32 %v313_v23, %v1073_v38 }
  0xcb   : > { %v298_v54 = vsub.f32 1.5, %v297_v28 }
  0xcc   : > { %v191_v16 = vsub.f32 1.5, %v190_v55 }
  0xcd   : > { %v299_v11 = vmul.f32 %v805_v0, %v298_v54 }
  0xce   : > { %699 = vmatpush.xpose.msk.msra.mxu0 %vm182_vm0, %v461_v14  ;;  %v192_v36 = vmul.f32 %v807_v58, %v191_v16 }
  0xcf   : > { %v303_v49 = vsel %vm302_vm3, %v805_v0, %v299_v11 }
  0xd0   : > { %v454_v63 = vmul.f32 %v303_v49, %v1085_v45  ;;  %v196_v37 = vsel %vm195_vm6, %v807_v58, %v192_v36 }
  0xd1   : > { %v197_v25 = vmul.f32 %v196_v37, %v1090_v46 }
  0xd2   : > { %700 = vmatpush.xpose.msk.msra.mxu0 %vm182_vm0, %v460_v52 }
  0xd6   : > { %701 = vmatpush.xpose.msk.msra.mxu0 %vm182_vm0, %v459_v2 }
  0xda   : > { %702 = vmatpush.xpose.msk.msra.mxu0 %vm182_vm0, %v458_v10 }
  0xde   : > { %703 = vmatpush.xpose.msk.msra.mxu0 %vm182_vm0, %v457_v51 }
  0xe2   : > { %704 = vmatpush.xpose.msk.msra.mxu0 %vm182_vm0, %v456_v8 }
  0xe6   : > { %705 = vmatpush.xpose.msk.msra.mxu0 %vm182_vm0, %v455_v24 }
  0xea   : > { %706 = vmatpush.xpose.msk.msra.mxu0 %vm182_vm0, %v454_v63 }
  0xed   : > { %707 = vmatmul.msk.f32.vlgmr.msra.gmra.mxu0 %vm182_vm0, %v197_v25 }
 0x16a   : > { %v538_v26 = vpop.f32.mrf.mxu0 }
 0x16b LB: >> { %s549_s17 = sld [smem:[#allocation3 + %s903_s16]]  ;;  %s551_s18 = sadd.s32 128, %s1369_s13  ;;  %s903_s16 = sphi %s901_s16, %s547_s16   ;;  %s899_s15 = sphi %s897_s15, %s898_s15  }
 0x16c   : >> { %s547_s16 = sadd.s32 1, %s903_s16  }
 0x16d   : >> { %p544_p0 = scmp.ge.s32.totalorder %s547_s16, 8  }
 0x171   : >> { %p550_p11 = scmp.ge.s32.totalorder %s549_s17, %s1369_s13  ;;  %p552_p12 = scmp.lt.s32.totalorder %s549_s17, %s551_s18 }
 0x173   : >> { %p553_p13 = pnand %p552_p12, %p550_p11 }
 0x175   : >> { %s709_s23 = scalar_select %p553_p13, 0, 1 }
 0x176   : > { %546 = sbr.rel (!%p544_p0) target bundleno = 363 (0x16b), region = 82 }
 0x177   : >> { %s1378_s15 = sor.u32 %s899_s15, %s709_s23  }
 0x178   : >> { %s1450_s25 = smov %s1378_s15 }
 0x179   : >> { %s898_s15 = smov %s1450_s25   ;;  %p710_p1 = scmp.le.s32.totalorder (%p544_p0), %s1450_s25, 0 }
 0x17b   : > { %560 = sbr.rel (%p710_p1) target bundleno = 506 (0x1fa), region = 43 }
 0x180   : > { %v587_v38 = vld [vmem:[%s1424_s1] sm:$0xff]  ;;  %v906_v45 = vmov 0   ;;  %v561_v46 = vmul.f32 %v538_v26, %v538_v26  ;;  %v583_v43 = vlaneseq  ;;  %v577_v19 = vmul.f32 0.87758255, %v538_v26 }
 0x181   : > { %808 = vset.pattern.permute.xlu0 %v906_v45  ;;  %v585_v47 = vstv %s1369_s13  ;;  %v711_v48 = vadd.f32 -0.23971277, %v538_v26  ;;  %vm580_vm8 = vcmp.gt.f32.partialorder %v538_v26, -0.87758255 }
 0x182   : > { %589 = vperm.xlu0 %808, %v587_v38   ;;  %v562_v56 = vsub.f32 1.0, %v561_v46  ;;  %v584_v14 = vand.u32 127, %v583_v43 }
 0x184   : > { %v563_v35 = vmax.f32 %v562_v56, 0.0  ;;  %v586_v50 = vadd.s32 %v585_v47, %v584_v14 }
 0x186   : > { %v564_v30 = vmin.f32 %v563_v35, 1.0 }
 0x188   : > { %809 = vrsqrt.f32 %v564_v30  ;;  %vm572_vm0 = vcmp.eq.f32.partialorder %v564_v30, inf  ;;  %v575_v22 = vand.u32 2147483648, %v564_v30  ;;  %vm574_vm7 = vcmp.eq.f32.partialorder %v564_v30, 0.0 }
 0x18e   : > { %v810_v32 = vpop.eup %809 }
 0x18f   : > { %v566_v18 = vmul.f32 %v810_v32, %v564_v30 }
 0x191   : > { %v567_v33 = vmul.f32 %v810_v32, %v566_v18 }
 0x193   : > { %v568_v61 = vmul.f32 0.5, %v567_v33 }
 0x195   : > { %v569_v57 = vsub.f32 1.5, %v568_v61 }
 0x197   : > { %v570_v39 = vmul.f32 %v810_v32, %v569_v57 }
 0x199   : > { %v571_v40 = vmul.f32 %v570_v39, %v564_v30 }
 0x19b   : > { %v573_v53 = vsel %vm572_vm0, %v564_v30, %v571_v40 }
 0x19c   : > { %v576_v42 = vsel %vm574_vm7, %v575_v22, %v573_v53 }
 0x19d   : > { %v578_v44 = vmul.f32 0.47942555, %v576_v42 }
 0x19f   : > { %v579_v4 = vsub.f32 %v577_v19, %v578_v44 }
 0x1a1   : > { %v582_v0 = vsel %vm580_vm8, %v579_v4, %v711_v48 }
 0x1f4   : > { %v590_v7 = vpop.permute.xlu0 %589 }
 0x1f5   : > { %vm591_vm9 = vcmp.eq.s32.totalorder %v586_v50, %v590_v7 }
 0x1f6   : > { %v592_v20 = vsel %vm591_vm9, %v582_v0, %v538_v26 }
 0x1f7   : > { %v593_v52 = vmul.f32 30.0, %v592_v20 }
 0x1f9   : > { %594 = vst [vmem:[%s1374_s14] sm:$0xff] %v593_v52 }
 0x1fa PF: > { %p712_p2 = scmp.gt.s32.totalorder %s1450_s25, 0 }
 0x1fc   : > { %598 = sbr.rel (%p712_p2) target bundleno = 516 (0x204), region = 47 }
 0x201   : > { %v599_v9 = vmul.f32 30.0, %v538_v26 }
 0x203   : > { %600 = vst [vmem:[%s1374_s14] sm:$0xff] %v599_v9 }
 0x204 PF: > { %s714_s5 = sshll.u32 %s956_s0, 3  ;;  %s614_s10 = sshll.u32 %s1374_s14, 4  ;;  %s615_s10 = int_to_ptr.vmem [resolvable:$true] %s614_s10 }
 0x205   : > { %s612_s8 = scalar_lea.hbm %s1427_s4, %s714_s5  ;;  %s602_s12 = scalar_lea.sflag [#allocation5], %s171_s9 }
 0x206   : > { %s616_s11 = sshll.u32 %s612_s8, 4  ;;  %s843_s0 = scalar_lea.hbm %s1427_s4, 24  ;;  %s617_s11 = int_to_ptr.hbm [resolvable:$true] %s616_s11 }
 0x207   : > { %s837_s13 = sshra.s32 %s617_s11, 4  ;;  %s838_s13 = int_to_ptr.hbm [resolvable:$true] %s837_s13 }
 0x208   : > { %s839_s15 = scalar_lea.hbm %s838_s13, 8  ;;  %p844_p8 = scmp.lt.s32.totalorder %s838_s13, %s1427_s4 }
 0x209   : > { %p840_p3 = scmp.ne.s32.totalorder %s838_s13, %s839_s15  ;;  %p845_p9 = scmp.lt.s32.totalorder %s843_s0, %s839_s15 }
 0x20b   : > { %p841_p4 = pnand %p840_p3, %p973_p5  ;;  %p846_p10 = por %p845_p9, %p844_p8 }
 0x20d   : > { %p842_p7 = pneg %p841_p4 }
 0x20f   : > { %p847_p11 = pnand %p846_p10, %p842_p7 }
 0x211   : > { %850 = shalt.err (!%p847_p11)
}
 0x212   : > { %717 = dma.vmem_to_hbm [thread:$0]  (%p973_p5), %s615_s10, 128, %s617_s11, %s602_s12  }
 0x213 PF: > { %p723_p12 = scmp.ge.s32.totalorder %s895_s22, 2  ;;  %s628_s9 = sand.u32 1, %s883_s19  }
 0x214   : > { %s629_s14 = scalar_lea.sflag [#allocation5], %s628_s9 }
 0x215   : > { %p720_p13 = pnand %p723_p12, %p977_p6 }
 0x217   : > { %p721_p0 = pneg %p720_p13 }
 0x219   : > { %878 = dma.done.wait (%p721_p0), %s629_s14, 128  }
 0x21a   : > { %880 = vsyncadd (%p721_p0), %s629_s14, 4294967168  ;;  %p22_p1 = scmp.ge.s32.totalorder %s960_s24, 5   ;;  %s1451_s19 = smov %s887_s20 }
 0x21b   : > { %s1452_s20 = smov %s891_s21  ;;  %s1453_s21 = smov %s971_s27 }
 0x21c   : > { %s1454_s22 = smov %s960_s24  ;;  %24 = sbr.rel (!%p22_p1) target bundleno = 9 (0x9), region = 93 }
 0x221   :  { %635 = vsyncpa [#allocation5], 1 }
 0x222   :  { %637 = vsyncpa [#allocation5 + $0x1], 1 }

</bundles_post_ra>
